<compile_context>
chip_gen: v7x
topology: tpu7x:2x2x1
jax: 0.10.0
libtpu: 0.0.40
codegen_flags: <defaults>
</compile_context>

<pallas_src>
import functools

import jax
import jax.numpy as jnp
from jax.experimental import pallas as pl
from jax.experimental.pallas import tpu as pltpu


def lstm_kernel(x_ref, wih_ref, whh_ref, b_ref, wfc_ref, bfc_ref, out_ref,
                xp_ref, *, T, Bb, H):
    # ---- Prologue (off the critical path): hoisted input projection for all
    # time steps of this batch block, staged into a VMEM scratch so the
    # recurrence reads clean aligned slabs instead of slicing a live value.
    # (T*Bb, I) @ (I, 4H) + (1, 4H) -> (T*Bb, 4H), bias broadcast done once.
    xp_ref[...] = (
        jnp.dot(x_ref[...], wih_ref[...], preferred_element_type=jnp.float32)
        + b_ref[...])

    w_hh = whh_ref[...]                       # (H, 4H) bf16, loaded once

    h = jnp.zeros((Bb, H), jnp.float32)
    c = jnp.zeros((Bb, H), jnp.float32)

    # ---- Recurrence: ONE fused lane-dense bf16 matmul per step, fully
    # unrolled (small static T).  Steps are serially dependent, so this chain
    # is latency-critical; everything heavy has been hoisted off it.
    # TODO(synk): for long T switch to lax.fori_loop(unroll=2-4) with
    # pl.ds(pl.multiple_of(t * Bb, Bb), Bb) reads, and tile xp over T (second
    # grid axis / emit_pipeline) before raising vmem_limit_bytes -- v7x has
    # only 64 MiB physical VMEM (32 MiB scoped default).
    for t in range(T):
        xp_t = xp_ref[pl.ds(t * Bb, Bb), :]                       # (Bb, 4H) vld
        gates = xp_t + jnp.dot(h.astype(jnp.bfloat16), w_hh,
                               preferred_element_type=jnp.float32)
        # Fused gate layout [i, f, o, g]; nonlinearities on full lane-dense
        # slabs (2 EUP pushes), then extract the gates.
        sg = jax.nn.sigmoid(gates)                                # (Bb, 4H)
        tg = jnp.tanh(gates)                                      # (Bb, 4H)
        i = sg[:, 0 * H:1 * H]
        f = sg[:, 1 * H:2 * H]
        o = sg[:, 2 * H:3 * H]
        g = tg[:, 3 * H:4 * H]
        c = f * c + i * g
        h = o * jnp.tanh(c)
        # TODO(synk): for H < 128 the gate extraction still costs a few lane
        # rotates per step; a pltpu.roll-based layout with a zero-padded W_hh
        # could remove them -- adopt only after a bundle dump confirms the win.

    # fc on the last time-step hidden state.  O=3 -> masked vst; negligible at
    # this size (keep lane-dense / pad only if O ever grows).
    out_ref[...] = (jnp.dot(h, wfc_ref[...], preferred_element_type=jnp.float32)
                    + bfc_ref[...])


def prepare_params(w_ih, w_hh, b_ih, b_hh, w_fc, b_fc):
    """One-time (init-time) parameter repacking.  NOT on the per-call path.

    w_ih: (4, I, H), w_hh: (4, H, H), b_ih/b_hh: (4, 1, H) in PyTorch LSTM gate
    order [i, f, g, o].  Returns fused tensors in kernel gate order
    [i, f, o, g], with the two biases summed and W_hh cast to bf16.
    """
    order = (0, 1, 3, 2)                                   # [i,f,g,o] -> [i,f,o,g]
    w_ih_f = jnp.concatenate([w_ih[k] for k in order], axis=-1)   # (I, 4H) f32
    w_hh_f = jnp.concatenate([w_hh[k] for k in order],
                             axis=-1).astype(jnp.bfloat16)        # (H, 4H) bf16
    b_f = jnp.concatenate([b_ih[k] + b_hh[k] for k in order], axis=-1)  # (1, 4H)
    return (w_ih_f, w_hh_f, b_f,
            jnp.asarray(w_fc, jnp.float32), jnp.asarray(b_fc, jnp.float32))


@jax.jit
def rnn_forward(x_bti, params):
    """x_bti: (B, T, I) f32.  params: output of prepare_params().  -> (B, O)."""
    w_ih_f, w_hh_f, b_f, w_fc, b_fc = params
    B, T, I = x_bti.shape
    H = w_hh_f.shape[0]
    O = w_fc.shape[-1]

    # Batch blocking: one grid step per block, marked "parallel" so large
    # batches shard across v7x's two TensorCores.  At the demo B=2 this is a
    # single grid step (Bb == B), identical to the unblocked kernel.
    Bb = B if B <= 128 else 128
    assert B % Bb == 0 and (Bb == B or Bb % 8 == 0)
    nb = B // Bb

    # The only per-call wrapper op: relayout x so each batch block is
    # time-major & flattened -> the hoisted projection is one in-kernel matmul.
    # TODO(synk): emit x time-major upstream to remove this op entirely.
    x_tm = (x_bti.reshape(nb, Bb, T, I)
            .transpose(0, 2, 1, 3)
            .reshape(nb, T * Bb, I))

    kernel = functools.partial(lstm_kernel, T=T, Bb=Bb, H=H)

    cost = pl.CostEstimate(
        flops=2 * T * B * I * 4 * H + 2 * T * B * H * 4 * H + 2 * B * H * O,
        transcendentals=T * B * 9 * H,
        bytes_accessed=(x_tm.size * 4 + w_ih_f.size * 4 + w_hh_f.size * 2
                        + b_f.size * 4 + w_fc.size * 4 + b_fc.size * 4
                        + B * O * 4),
    )

    return pl.pallas_call(
        kernel,
        out_shape=jax.ShapeDtypeStruct((B, O), jnp.float32),
        grid_spec=pltpu.PrefetchScalarGridSpec(
            num_scalar_prefetch=0,
            grid=(nb,),                      # batch blocks; time loop in-kernel
            in_specs=[
                pl.BlockSpec((None, T * Bb, I), lambda n: (n, 0, 0)),  # x block
                pl.BlockSpec((I, 4 * H), lambda n: (0, 0)),       # W_ih fused
                pl.BlockSpec((H, 4 * H), lambda n: (0, 0)),       # W_hh fused bf16
                pl.BlockSpec((1, 4 * H), lambda n: (0, 0)),       # bias fused
                pl.BlockSpec((H, O), lambda n: (0, 0)),           # fc weight
                pl.BlockSpec((1, O), lambda n: (0, 0)),           # fc bias
            ],
            out_specs=pl.BlockSpec((Bb, O), lambda n: (n, 0)),
            scratch_shapes=[pltpu.VMEM((T * Bb, 4 * H), jnp.float32)],  # staged xp
        ),
        compiler_params=pltpu.CompilerParams(
            dimension_semantics=("parallel",),
            # Explicit budget; safe on v5e (16 MiB scoped default) and within
            # v7x's 64 MiB physical VMEM.
            vmem_limit_bytes=32 * 1024 * 1024,
        ),
        cost_estimate=cost,
    )(x_tm, w_ih_f, w_hh_f, b_f, w_fc, b_fc)


def rnn_forward_ref(x_bti, w_ih, w_hh, b_ih, b_hh, w_fc, b_fc):
    """Pure-JAX reference (same math as PyTorch single-layer LSTM + Linear)."""
    B, T, _ = x_bti.shape
    H = w_hh.shape[-1]
    b = b_ih + b_hh
    h = jnp.zeros((B, H), jnp.float32)
    c = jnp.zeros((B, H), jnp.float32)
    for t in range(T):
        x_t = x_bti[:, t]
        i = jax.nn.sigmoid(x_t @ w_ih[0] + h @ w_hh[0] + b[0])
        f = jax.nn.sigmoid(x_t @ w_ih[1] + h @ w_hh[1] + b[1])
        g = jnp.tanh(x_t @ w_ih[2] + h @ w_hh[2] + b[2])
        o = jax.nn.sigmoid(x_t @ w_ih[3] + h @ w_hh[3] + b[3])
        c = f * c + i * g
        h = o * jnp.tanh(c)
    return h @ w_fc + b_fc


if __name__ == "__main__":
    # Small shapes consistent with the module's forward:
    B, T = 2, 8          # batch, sequence length
    I = 4                # num_inputs
    H = 32               # hidden_size  (4H = 128 = one lane-dense vreg row)
    O = 3                # num_outputs

    key = jax.random.PRNGKey(0)
    k_x, k_wih, k_whh, k_bih, k_bhh, k_wfc, k_bfc = jax.random.split(key, 7)

    scale = 1.0 / jnp.sqrt(H)   # PyTorch default uniform(-1/sqrt(H), 1/sqrt(H))
    x = jax.random.normal(k_x, (B, T, I), jnp.float32)
    w_ih = jax.random.uniform(k_wih, (4, I, H), jnp.float32, -scale, scale)
    w_hh = jax.random.uniform(k_whh, (4, H, H), jnp.float32, -scale, scale)
    b_ih = jax.random.uniform(k_bih, (4, 1, H), jnp.float32, -scale, scale)
    b_hh = jax.random.uniform(k_bhh, (4, 1, H), jnp.float32, -scale, scale)
    w_fc = jax.random.uniform(k_wfc, (H, O), jnp.float32, -scale, scale)
    b_fc = jax.random.uniform(k_bfc, (1, O), jnp.float32, -scale, scale)

    # Init-time (once per model, NOT per forward): fuse/repack parameters.
    params = jax.block_until_ready(
        prepare_params(w_ih, w_hh, b_ih, b_hh, w_fc, b_fc))

    out = rnn_forward(x, params)
    out = jax.block_until_ready(out)

    ref = rnn_forward_ref(x, w_ih, w_hh, b_ih, b_hh, w_fc, b_fc)
    assert out.shape == (B, O)
    # Tolerance loosened because W_hh / h use bf16 on the recurrent matmul
    # (observed error is ~1e-3 at these shapes).
    assert jnp.allclose(out, ref, atol=2e-2, rtol=2e-2), (out, ref)

    print("KERNEL_OK")
</pallas_src>

<mosaic_0001>
module attributes {stable_mosaic.version = 11 : i64} {
  func.func @lstm_kernel(%arg0: i32, %arg1: memref<1x16x4xf32, #tpu.memory_space<vmem>>, %arg2: memref<4x128xf32, #tpu.memory_space<vmem>>, %arg3: memref<32x128xbf16, #tpu.memory_space<vmem>>, %arg4: memref<1x128xf32, #tpu.memory_space<vmem>>, %arg5: memref<32x3xf32, #tpu.memory_space<vmem>>, %arg6: memref<1x3xf32, #tpu.memory_space<vmem>>, %arg7: memref<2x3xf32, #tpu.memory_space<vmem>>, %arg8: memref<16x128xf32, #tpu.memory_space<vmem>>) attributes {dimension_semantics = [#tpu.dimension_semantics<parallel>], iteration_bounds = array<i64: 1>, scalar_prefetch = 0 : i64, scratch_operands = 1 : i64, tpu.core_type = #tpu.core_type<tc>, window_params = [{transform_indices = @transform_0, window_bounds = array<i64: 1, 16, 4>}, {pipeline_mode = #tpu.pipeline_mode<synchronous>, transform_indices = @transform_1, window_bounds = array<i64: 4, 128>}, {pipeline_mode = #tpu.pipeline_mode<synchronous>, transform_indices = @transform_2, window_bounds = array<i64: 32, 128>}, {pipeline_mode = #tpu.pipeline_mode<synchronous>, transform_indices = @transform_3, window_bounds = array<i64: 1, 128>}, {pipeline_mode = #tpu.pipeline_mode<synchronous>, transform_indices = @transform_4, window_bounds = array<i64: 32, 3>}, {pipeline_mode = #tpu.pipeline_mode<synchronous>, transform_indices = @transform_5, window_bounds = array<i64: 1, 3>}, {transform_indices = @transform_6, window_bounds = array<i64: 2, 3>}]} {
    %c0 = arith.constant 0 : index
    %c0_0 = arith.constant 0 : index
    %c0_1 = arith.constant 0 : index
    %0 = vector.load %arg1[%c0, %c0_0, %c0_1] : memref<1x16x4xf32, #tpu.memory_space<vmem>>, vector<1x16x4xf32>
    %1 = vector.shape_cast %0 : vector<1x16x4xf32> to vector<16x4xf32>
    %c0_2 = arith.constant 0 : index
    %c0_3 = arith.constant 0 : index
    %2 = vector.load %arg2[%c0_2, %c0_3] : memref<4x128xf32, #tpu.memory_space<vmem>>, vector<4x128xf32>
    %cst = arith.constant dense<0.000000e+00> : vector<16x128xf32>
    %3 = tpu.matmul %1, %2, %cst {dimension_numbers = #tpu.dot_dimension_numbers<[1], [0], [0], [1], [0, 0, 1, 1], [], []>} : vector<16x4xf32>, vector<4x128xf32>, vector<16x128xf32> -> vector<16x128xf32>
    %c0_4 = arith.constant 0 : index
    %c0_5 = arith.constant 0 : index
    %4 = vector.load %arg4[%c0_4, %c0_5] : memref<1x128xf32, #tpu.memory_space<vmem>>, vector<1x128xf32>
    %5 = vector.broadcast %4 : vector<1x128xf32> to vector<16x128xf32>
    %6 = arith.addf %3, %5 : vector<16x128xf32>
    %c0_6 = arith.constant 0 : index
    %c0_7 = arith.constant 0 : index
    %7 = vector.load %arg8[%c0_6, %c0_7] : memref<16x128xf32, #tpu.memory_space<vmem>>, vector<16x128xf32>
    tpu.vector_store %arg8[%c0_6, %c0_7], %6 {strides = array<i32>} : memref<16x128xf32, #tpu.memory_space<vmem>>, vector<16x128xf32>,
    %c0_8 = arith.constant 0 : index
    %c0_9 = arith.constant 0 : index
    %8 = vector.load %arg3[%c0_8, %c0_9] : memref<32x128xbf16, #tpu.memory_space<vmem>>, vector<32x128xbf16>
    %cst_10 = arith.constant 0.000000e+00 : f32
    %9 = vector.broadcast %cst_10 : f32 to vector<2x32xf32>
    %cst_11 = arith.constant 0.000000e+00 : f32
    %10 = vector.broadcast %cst_11 : f32 to vector<2x32xf32>
    %c0_12 = arith.constant 0 : index
    %c0_13 = arith.constant 0 : index
    %11 = vector.load %arg8[%c0_12, %c0_13] : memref<16x128xf32, #tpu.memory_space<vmem>>, vector<2x128xf32>
    %12 = arith.truncf %9 : vector<2x32xf32> to vector<2x32xbf16>
    %cst_14 = arith.constant dense<0.000000e+00> : vector<2x128xf32>
    %13 = tpu.matmul %12, %8, %cst_14 {dimension_numbers = #tpu.dot_dimension_numbers<[1], [0], [0], [1], [0, 0, 1, 1], [], []>} : vector<2x32xbf16>, vector<32x128xbf16>, vector<2x128xf32> -> vector<2x128xf32>
    %14 = arith.addf %11, %13 : vector<2x128xf32>
    %15 = arith.negf %14 : vector<2x128xf32>
    %16 = math.exp %15 : vector<2x128xf32>
    %cst_15 = arith.constant 1.000000e+00 : f32
    %17 = vector.broadcast %cst_15 : f32 to vector<2x128xf32>
    %18 = arith.addf %17, %16 : vector<2x128xf32>
    %19 = arith.divf %17, %18 : vector<2x128xf32>
    %20 = math.tanh %14 : vector<2x128xf32>
    %21 = vector.extract_strided_slice %19 {offsets = [0, 0], sizes = [2, 32], strides = [1, 1]} : vector<2x128xf32> to vector<2x32xf32>
    %22 = vector.extract_strided_slice %19 {offsets = [0, 32], sizes = [2, 32], strides = [1, 1]} : vector<2x128xf32> to vector<2x32xf32>
    %23 = vector.extract_strided_slice %19 {offsets = [0, 64], sizes = [2, 32], strides = [1, 1]} : vector<2x128xf32> to vector<2x32xf32>
    %24 = vector.extract_strided_slice %20 {offsets = [0, 96], sizes = [2, 32], strides = [1, 1]} : vector<2x128xf32> to vector<2x32xf32>
    %25 = arith.mulf %22, %10 : vector<2x32xf32>
    %26 = arith.mulf %21, %24 : vector<2x32xf32>
    %27 = arith.addf %25, %26 : vector<2x32xf32>
    %28 = math.tanh %27 : vector<2x32xf32>
    %29 = arith.mulf %23, %28 : vector<2x32xf32>
    %c2 = arith.constant 2 : index
    %c0_16 = arith.constant 0 : index
    %30 = vector.load %arg8[%c2, %c0_16] : memref<16x128xf32, #tpu.memory_space<vmem>>, vector<2x128xf32>
    %31 = arith.truncf %29 : vector<2x32xf32> to vector<2x32xbf16>
    %cst_17 = arith.constant dense<0.000000e+00> : vector<2x128xf32>
    %32 = tpu.matmul %31, %8, %cst_17 {dimension_numbers = #tpu.dot_dimension_numbers<[1], [0], [0], [1], [0, 0, 1, 1], [], []>} : vector<2x32xbf16>, vector<32x128xbf16>, vector<2x128xf32> -> vector<2x128xf32>
    %33 = arith.addf %30, %32 : vector<2x128xf32>
    %34 = arith.negf %33 : vector<2x128xf32>
    %35 = math.exp %34 : vector<2x128xf32>
    %cst_18 = arith.constant 1.000000e+00 : f32
    %36 = vector.broadcast %cst_18 : f32 to vector<2x128xf32>
    %37 = arith.addf %36, %35 : vector<2x128xf32>
    %38 = arith.divf %36, %37 : vector<2x128xf32>
    %39 = math.tanh %33 : vector<2x128xf32>
    %40 = vector.extract_strided_slice %38 {offsets = [0, 0], sizes = [2, 32], strides = [1, 1]} : vector<2x128xf32> to vector<2x32xf32>
    %41 = vector.extract_strided_slice %38 {offsets = [0, 32], sizes = [2, 32], strides = [1, 1]} : vector<2x128xf32> to vector<2x32xf32>
    %42 = vector.extract_strided_slice %38 {offsets = [0, 64], sizes = [2, 32], strides = [1, 1]} : vector<2x128xf32> to vector<2x32xf32>
    %43 = vector.extract_strided_slice %39 {offsets = [0, 96], sizes = [2, 32], strides = [1, 1]} : vector<2x128xf32> to vector<2x32xf32>
    %44 = arith.mulf %41, %27 : vector<2x32xf32>
    %45 = arith.mulf %40, %43 : vector<2x32xf32>
    %46 = arith.addf %44, %45 : vector<2x32xf32>
    %47 = math.tanh %46 : vector<2x32xf32>
    %48 = arith.mulf %42, %47 : vector<2x32xf32>
    %c4 = arith.constant 4 : index
    %c0_19 = arith.constant 0 : index
    %49 = vector.load %arg8[%c4, %c0_19] : memref<16x128xf32, #tpu.memory_space<vmem>>, vector<2x128xf32>
    %50 = arith.truncf %48 : vector<2x32xf32> to vector<2x32xbf16>
    %cst_20 = arith.constant dense<0.000000e+00> : vector<2x128xf32>
    %51 = tpu.matmul %50, %8, %cst_20 {dimension_numbers = #tpu.dot_dimension_numbers<[1], [0], [0], [1], [0, 0, 1, 1], [], []>} : vector<2x32xbf16>, vector<32x128xbf16>, vector<2x128xf32> -> vector<2x128xf32>
    %52 = arith.addf %49, %51 : vector<2x128xf32>
    %53 = arith.negf %52 : vector<2x128xf32>
    %54 = math.exp %53 : vector<2x128xf32>
    %cst_21 = arith.constant 1.000000e+00 : f32
    %55 = vector.broadcast %cst_21 : f32 to vector<2x128xf32>
    %56 = arith.addf %55, %54 : vector<2x128xf32>
    %57 = arith.divf %55, %56 : vector<2x128xf32>
    %58 = math.tanh %52 : vector<2x128xf32>
    %59 = vector.extract_strided_slice %57 {offsets = [0, 0], sizes = [2, 32], strides = [1, 1]} : vector<2x128xf32> to vector<2x32xf32>
    %60 = vector.extract_strided_slice %57 {offsets = [0, 32], sizes = [2, 32], strides = [1, 1]} : vector<2x128xf32> to vector<2x32xf32>
    %61 = vector.extract_strided_slice %57 {offsets = [0, 64], sizes = [2, 32], strides = [1, 1]} : vector<2x128xf32> to vector<2x32xf32>
    %62 = vector.extract_strided_slice %58 {offsets = [0, 96], sizes = [2, 32], strides = [1, 1]} : vector<2x128xf32> to vector<2x32xf32>
    %63 = arith.mulf %60, %46 : vector<2x32xf32>
    %64 = arith.mulf %59, %62 : vector<2x32xf32>
    %65 = arith.addf %63, %64 : vector<2x32xf32>
    %66 = math.tanh %65 : vector<2x32xf32>
    %67 = arith.mulf %61, %66 : vector<2x32xf32>
    %c6 = arith.constant 6 : index
    %c0_22 = arith.constant 0 : index
    %68 = vector.load %arg8[%c6, %c0_22] : memref<16x128xf32, #tpu.memory_space<vmem>>, vector<2x128xf32>
    %69 = arith.truncf %67 : vector<2x32xf32> to vector<2x32xbf16>
    %cst_23 = arith.constant dense<0.000000e+00> : vector<2x128xf32>
    %70 = tpu.matmul %69, %8, %cst_23 {dimension_numbers = #tpu.dot_dimension_numbers<[1], [0], [0], [1], [0, 0, 1, 1], [], []>} : vector<2x32xbf16>, vector<32x128xbf16>, vector<2x128xf32> -> vector<2x128xf32>
    %71 = arith.addf %68, %70 : vector<2x128xf32>
    %72 = arith.negf %71 : vector<2x128xf32>
    %73 = math.exp %72 : vector<2x128xf32>
    %cst_24 = arith.constant 1.000000e+00 : f32
    %74 = vector.broadcast %cst_24 : f32 to vector<2x128xf32>
    %75 = arith.addf %74, %73 : vector<2x128xf32>
    %76 = arith.divf %74, %75 : vector<2x128xf32>
    %77 = math.tanh %71 : vector<2x128xf32>
    %78 = vector.extract_strided_slice %76 {offsets = [0, 0], sizes = [2, 32], strides = [1, 1]} : vector<2x128xf32> to vector<2x32xf32>
    %79 = vector.extract_strided_slice %76 {offsets = [0, 32], sizes = [2, 32], strides = [1, 1]} : vector<2x128xf32> to vector<2x32xf32>
    %80 = vector.extract_strided_slice %76 {offsets = [0, 64], sizes = [2, 32], strides = [1, 1]} : vector<2x128xf32> to vector<2x32xf32>
    %81 = vector.extract_strided_slice %77 {offsets = [0, 96], sizes = [2, 32], strides = [1, 1]} : vector<2x128xf32> to vector<2x32xf32>
    %82 = arith.mulf %79, %65 : vector<2x32xf32>
    %83 = arith.mulf %78, %81 : vector<2x32xf32>
    %84 = arith.addf %82, %83 : vector<2x32xf32>
    %85 = math.tanh %84 : vector<2x32xf32>
    %86 = arith.mulf %80, %85 : vector<2x32xf32>
    %c8 = arith.constant 8 : index
    %c0_25 = arith.constant 0 : index
    %87 = vector.load %arg8[%c8, %c0_25] : memref<16x128xf32, #tpu.memory_space<vmem>>, vector<2x128xf32>
    %88 = arith.truncf %86 : vector<2x32xf32> to vector<2x32xbf16>
    %cst_26 = arith.constant dense<0.000000e+00> : vector<2x128xf32>
    %89 = tpu.matmul %88, %8, %cst_26 {dimension_numbers = #tpu.dot_dimension_numbers<[1], [0], [0], [1], [0, 0, 1, 1], [], []>} : vector<2x32xbf16>, vector<32x128xbf16>, vector<2x128xf32> -> vector<2x128xf32>
    %90 = arith.addf %87, %89 : vector<2x128xf32>
    %91 = arith.negf %90 : vector<2x128xf32>
    %92 = math.exp %91 : vector<2x128xf32>
    %cst_27 = arith.constant 1.000000e+00 : f32
    %93 = vector.broadcast %cst_27 : f32 to vector<2x128xf32>
    %94 = arith.addf %93, %92 : vector<2x128xf32>
    %95 = arith.divf %93, %94 : vector<2x128xf32>
    %96 = math.tanh %90 : vector<2x128xf32>
    %97 = vector.extract_strided_slice %95 {offsets = [0, 0], sizes = [2, 32], strides = [1, 1]} : vector<2x128xf32> to vector<2x32xf32>
    %98 = vector.extract_strided_slice %95 {offsets = [0, 32], sizes = [2, 32], strides = [1, 1]} : vector<2x128xf32> to vector<2x32xf32>
    %99 = vector.extract_strided_slice %95 {offsets = [0, 64], sizes = [2, 32], strides = [1, 1]} : vector<2x128xf32> to vector<2x32xf32>
    %100 = vector.extract_strided_slice %96 {offsets = [0, 96], sizes = [2, 32], strides = [1, 1]} : vector<2x128xf32> to vector<2x32xf32>
    %101 = arith.mulf %98, %84 : vector<2x32xf32>
    %102 = arith.mulf %97, %100 : vector<2x32xf32>
    %103 = arith.addf %101, %102 : vector<2x32xf32>
    %104 = math.tanh %103 : vector<2x32xf32>
    %105 = arith.mulf %99, %104 : vector<2x32xf32>
    %c10 = arith.constant 10 : index
    %c0_28 = arith.constant 0 : index
    %106 = vector.load %arg8[%c10, %c0_28] : memref<16x128xf32, #tpu.memory_space<vmem>>, vector<2x128xf32>
    %107 = arith.truncf %105 : vector<2x32xf32> to vector<2x32xbf16>
    %cst_29 = arith.constant dense<0.000000e+00> : vector<2x128xf32>
    %108 = tpu.matmul %107, %8, %cst_29 {dimension_numbers = #tpu.dot_dimension_numbers<[1], [0], [0], [1], [0, 0, 1, 1], [], []>} : vector<2x32xbf16>, vector<32x128xbf16>, vector<2x128xf32> -> vector<2x128xf32>
    %109 = arith.addf %106, %108 : vector<2x128xf32>
    %110 = arith.negf %109 : vector<2x128xf32>
    %111 = math.exp %110 : vector<2x128xf32>
    %cst_30 = arith.constant 1.000000e+00 : f32
    %112 = vector.broadcast %cst_30 : f32 to vector<2x128xf32>
    %113 = arith.addf %112, %111 : vector<2x128xf32>
    %114 = arith.divf %112, %113 : vector<2x128xf32>
    %115 = math.tanh %109 : vector<2x128xf32>
    %116 = vector.extract_strided_slice %114 {offsets = [0, 0], sizes = [2, 32], strides = [1, 1]} : vector<2x128xf32> to vector<2x32xf32>
    %117 = vector.extract_strided_slice %114 {offsets = [0, 32], sizes = [2, 32], strides = [1, 1]} : vector<2x128xf32> to vector<2x32xf32>
    %118 = vector.extract_strided_slice %114 {offsets = [0, 64], sizes = [2, 32], strides = [1, 1]} : vector<2x128xf32> to vector<2x32xf32>
    %119 = vector.extract_strided_slice %115 {offsets = [0, 96], sizes = [2, 32], strides = [1, 1]} : vector<2x128xf32> to vector<2x32xf32>
    %120 = arith.mulf %117, %103 : vector<2x32xf32>
    %121 = arith.mulf %116, %119 : vector<2x32xf32>
    %122 = arith.addf %120, %121 : vector<2x32xf32>
    %123 = math.tanh %122 : vector<2x32xf32>
    %124 = arith.mulf %118, %123 : vector<2x32xf32>
    %c12 = arith.constant 12 : index
    %c0_31 = arith.constant 0 : index
    %125 = vector.load %arg8[%c12, %c0_31] : memref<16x128xf32, #tpu.memory_space<vmem>>, vector<2x128xf32>
    %126 = arith.truncf %124 : vector<2x32xf32> to vector<2x32xbf16>
    %cst_32 = arith.constant dense<0.000000e+00> : vector<2x128xf32>
    %127 = tpu.matmul %126, %8, %cst_32 {dimension_numbers = #tpu.dot_dimension_numbers<[1], [0], [0], [1], [0, 0, 1, 1], [], []>} : vector<2x32xbf16>, vector<32x128xbf16>, vector<2x128xf32> -> vector<2x128xf32>
    %128 = arith.addf %125, %127 : vector<2x128xf32>
    %129 = arith.negf %128 : vector<2x128xf32>
    %130 = math.exp %129 : vector<2x128xf32>
    %cst_33 = arith.constant 1.000000e+00 : f32
    %131 = vector.broadcast %cst_33 : f32 to vector<2x128xf32>
    %132 = arith.addf %131, %130 : vector<2x128xf32>
    %133 = arith.divf %131, %132 : vector<2x128xf32>
    %134 = math.tanh %128 : vector<2x128xf32>
    %135 = vector.extract_strided_slice %133 {offsets = [0, 0], sizes = [2, 32], strides = [1, 1]} : vector<2x128xf32> to vector<2x32xf32>
    %136 = vector.extract_strided_slice %133 {offsets = [0, 32], sizes = [2, 32], strides = [1, 1]} : vector<2x128xf32> to vector<2x32xf32>
    %137 = vector.extract_strided_slice %133 {offsets = [0, 64], sizes = [2, 32], strides = [1, 1]} : vector<2x128xf32> to vector<2x32xf32>
    %138 = vector.extract_strided_slice %134 {offsets = [0, 96], sizes = [2, 32], strides = [1, 1]} : vector<2x128xf32> to vector<2x32xf32>
    %139 = arith.mulf %136, %122 : vector<2x32xf32>
    %140 = arith.mulf %135, %138 : vector<2x32xf32>
    %141 = arith.addf %139, %140 : vector<2x32xf32>
    %142 = math.tanh %141 : vector<2x32xf32>
    %143 = arith.mulf %137, %142 : vector<2x32xf32>
    %c14 = arith.constant 14 : index
    %c0_34 = arith.constant 0 : index
    %144 = vector.load %arg8[%c14, %c0_34] : memref<16x128xf32, #tpu.memory_space<vmem>>, vector<2x128xf32>
    %145 = arith.truncf %143 : vector<2x32xf32> to vector<2x32xbf16>
    %cst_35 = arith.constant dense<0.000000e+00> : vector<2x128xf32>
    %146 = tpu.matmul %145, %8, %cst_35 {dimension_numbers = #tpu.dot_dimension_numbers<[1], [0], [0], [1], [0, 0, 1, 1], [], []>} : vector<2x32xbf16>, vector<32x128xbf16>, vector<2x128xf32> -> vector<2x128xf32>
    %147 = arith.addf %144, %146 : vector<2x128xf32>
    %148 = arith.negf %147 : vector<2x128xf32>
    %149 = math.exp %148 : vector<2x128xf32>
    %cst_36 = arith.constant 1.000000e+00 : f32
    %150 = vector.broadcast %cst_36 : f32 to vector<2x128xf32>
    %151 = arith.addf %150, %149 : vector<2x128xf32>
    %152 = arith.divf %150, %151 : vector<2x128xf32>
    %153 = math.tanh %147 : vector<2x128xf32>
    %154 = vector.extract_strided_slice %152 {offsets = [0, 0], sizes = [2, 32], strides = [1, 1]} : vector<2x128xf32> to vector<2x32xf32>
    %155 = vector.extract_strided_slice %152 {offsets = [0, 32], sizes = [2, 32], strides = [1, 1]} : vector<2x128xf32> to vector<2x32xf32>
    %156 = vector.extract_strided_slice %152 {offsets = [0, 64], sizes = [2, 32], strides = [1, 1]} : vector<2x128xf32> to vector<2x32xf32>
    %157 = vector.extract_strided_slice %153 {offsets = [0, 96], sizes = [2, 32], strides = [1, 1]} : vector<2x128xf32> to vector<2x32xf32>
    %158 = arith.mulf %155, %141 : vector<2x32xf32>
    %159 = arith.mulf %154, %157 : vector<2x32xf32>
    %160 = arith.addf %158, %159 : vector<2x32xf32>
    %161 = math.tanh %160 : vector<2x32xf32>
    %162 = arith.mulf %156, %161 : vector<2x32xf32>
    %c0_37 = arith.constant 0 : index
    %c0_38 = arith.constant 0 : index
    %163 = vector.load %arg5[%c0_37, %c0_38] : memref<32x3xf32, #tpu.memory_space<vmem>>, vector<32x3xf32>
    %cst_39 = arith.constant dense<0.000000e+00> : vector<2x3xf32>
    %164 = tpu.matmul %162, %163, %cst_39 {dimension_numbers = #tpu.dot_dimension_numbers<[1], [0], [0], [1], [0, 0, 1, 1], [], []>} : vector<2x32xf32>, vector<32x3xf32>, vector<2x3xf32> -> vector<2x3xf32>
    %c0_40 = arith.constant 0 : index
    %c0_41 = arith.constant 0 : index
    %165 = vector.load %arg6[%c0_40, %c0_41] : memref<1x3xf32, #tpu.memory_space<vmem>>, vector<1x3xf32>
    %166 = vector.broadcast %165 : vector<1x3xf32> to vector<2x3xf32>
    %167 = arith.addf %164, %166 : vector<2x3xf32>
    %c0_42 = arith.constant 0 : index
    %c0_43 = arith.constant 0 : index
    %168 = vector.load %arg7[%c0_42, %c0_43] : memref<2x3xf32, #tpu.memory_space<vmem>>, vector<2x3xf32>
    tpu.vector_store %arg7[%c0_42, %c0_43], %167 {strides = array<i32>} : memref<2x3xf32, #tpu.memory_space<vmem>>, vector<2x3xf32>,
    return
  }
  func.func @transform_0(%arg0: i32) -> (i32, i32, i32) {
    %c0_i32 = arith.constant 0 : i32
    %c0_i32_0 = arith.constant 0 : i32
    %c0_i32_1 = arith.constant 0 : i32
    return %arg0, %c0_i32, %c0_i32_0 : i32, i32, i32
  }
  func.func @transform_1(%arg0: i32) -> (i32, i32) {
    %c0_i32 = arith.constant 0 : i32
    %c0_i32_0 = arith.constant 0 : i32
    %c0_i32_1 = arith.constant 0 : i32
    return %c0_i32, %c0_i32_0 : i32, i32
  }
  func.func @transform_2(%arg0: i32) -> (i32, i32) {
    %c0_i32 = arith.constant 0 : i32
    %c0_i32_0 = arith.constant 0 : i32
    %c0_i32_1 = arith.constant 0 : i32
    return %c0_i32, %c0_i32_0 : i32, i32
  }
  func.func @transform_3(%arg0: i32) -> (i32, i32) {
    %c0_i32 = arith.constant 0 : i32
    %c0_i32_0 = arith.constant 0 : i32
    %c0_i32_1 = arith.constant 0 : i32
    return %c0_i32, %c0_i32_0 : i32, i32
  }
  func.func @transform_4(%arg0: i32) -> (i32, i32) {
    %c0_i32 = arith.constant 0 : i32
    %c0_i32_0 = arith.constant 0 : i32
    %c0_i32_1 = arith.constant 0 : i32
    return %c0_i32, %c0_i32_0 : i32, i32
  }
  func.func @transform_5(%arg0: i32) -> (i32, i32) {
    %c0_i32 = arith.constant 0 : i32
    %c0_i32_0 = arith.constant 0 : i32
    %c0_i32_1 = arith.constant 0 : i32
    return %c0_i32, %c0_i32_0 : i32, i32
  }
  func.func @transform_6(%arg0: i32) -> (i32, i32) {
    %c0_i32 = arith.constant 0 : i32
    %c0_i32_0 = arith.constant 0 : i32
    return %arg0, %c0_i32 : i32, i32
  }
}

</mosaic_0001>

<bundles_post_ra>
// kernel: rnn_forward.1
= control target key start
LH: loop header
LB: loop body
LE: loop exit
PB: predicated region body
PF: predicated region fallthrough
CT: control target
= control target key end

     0   :  { %vm42_vm0 = vcmask 1043456   ;;  %vm35_vm1 = vcmask 31744   ;;  %v1060_v4 = vmov 0.0   ;;  %s1241_s0 = inlined_call_operand.vmem [shape: f32[1,16,4], index: 0, kind: input, shape index: {}]   ;;  %s1242_s1 = inlined_call_operand.vmem [shape: f32[4,128], index: 1, kind: input, shape index: {}]   ;;  %s1243_s2 = inlined_call_operand.vmem [shape: bf16[32,128], index: 2, kind: input, shape index: {}]   ;;  %s1244_s3 = inlined_call_operand.vmem [shape: f32[1,128], index: 3, kind: input, shape index: {}]   ;;  %s1245_s4 = inlined_call_operand.vmem [shape: f32[32,3], index: 4, kind: input, shape index: {}]   ;;  %s1246_s5 = inlined_call_operand.vmem [shape: f32[1,3], index: 5, kind: input, shape index: {}]   ;;  %s1247_s6 = inlined_call_operand.hbm [shape: f32[2,3], index: 6, kind: output, shape index: {}]  }
   0x1   :  { %v27_v0 = vld [vmem:[%s1242_s1] sm:$0xf]  ;;  %v26_v2 = vld [vmem:[%s1241_s0 + $0x8] sm:$0xff]  ;;  %882 = vmatprep.subr.bf16.mxu1 %v1060_v4 }
   0x2   :  { %v25_v1 = vld [vmem:[%s1241_s0] sm:$0xff]  ;;  %877 = vmatprep.subr.msk.mxu0 %vm42_vm0, %v27_v0  ;;  %v1121_v5 = vld [vmem:[%s1243_s2 + $0x8] sm:$0xff]  }
   0x3   :  { %879 = vmatprep.mubr.msk.f32.mxu0 %vm35_vm1, %v25_v1  ;;  %v1114_v3 = vld [vmem:[%s1243_s2] sm:$0xff]   ;;  %878 = vmatpush3.msk.msra.mxu0 %vm42_vm0, %v27_v0 }
   0x4   :  { %880 = vmatmul.mubr.msk.f32.vlgmr.msra.gmra.mrb[0].mxu0 %vm35_vm1, %v26_v2  ;;  %883 = vmatpush3.bf16.msra.mxu1 %v1114_v3 }
   0x5   :  { %11 = vsyncpa [#allocation4], 0  ;;  %884 = vmatprep.subr.bf16.mxu1 %v1060_v4  ;;  %vm1061_vm2 = vmmov 0   ;;  %890 = vmatprep.subr.bf16.mxu0 %v1060_v4  ;;  %v1062_v6 = vmov 0   ;;  %v822_v7 = vld [vmem:[%s1244_s3] ss:$0 sm:$0xff] }
   0x6   :  { %886 = vmatprep.mubr.msk.bf16.mxu1 %vm1061_vm2, %v1060_v4  ;;  %894 = vmatprep.mubr.msk.bf16.mxu0 %vm1061_vm2, %v1060_v4  ;;  %s1063_s30 = smov 32   ;;  %s1064_s3 = smov 64   ;;  %vm140_vm3 = vcmask 261120   ;;  %vm806_vm4 = vcmask 17408  }
   0x7   :  { %891 = vmatpush3.bf16.msra.mxu0 %v1114_v3  ;;  %s1066_s17 = smov [#allocation3]  }
   0x8   :  { %885 = vmatpush3.bf16.msra.mxu1 %v1121_v5  ;;  %892 = vmatprep.subr.bf16.mxu0 %v1060_v4 }
   0x9   :  { %898 = vmatprep.subr.bf16.mxu1 %v1060_v4 }
   0xb   :  { %887 = vmatmul.mubr.bf16.vlgmr.msra.gmra.mrb[0].mxu1 %v1062_v6  ;;  %893 = vmatpush3.bf16.msra.mxu0 %v1121_v5 }
   0xc   :  { %899 = vmatpush3.bf16.msra.mxu1 %v1114_v3  ;;  %902 = vmatprep.mubr.msk.bf16.mxu1 %vm1061_vm2, %v1060_v4 }
   0xd   :  { %900 = vmatprep.subr.bf16.mxu1 %v1060_v4  ;;  %906 = vmatprep.subr.bf16.mxu0 %v1060_v4 }
  0x10   :  { %901 = vmatpush3.bf16.msra.mxu1 %v1121_v5 }
  0x11   :  { %914 = vmatprep.subr.bf16.mxu1 %v1060_v4 }
  0xd7   :  { %v881_v8 = vpop.f32.mrb[0].mxu0 }
  0xd8   :  { %v118_v9 = vadd.f32 %v881_v8, %v822_v7  ;;  %v112_v10 = vpop.f32.mrb[1].mxu0 }
  0xd9   :  { %v113_v11 = vadd.f32 %v822_v7, %v112_v10 }
  0xda   :  { %122 = vst [vmem:[#allocation2 + $0x8] sm:$0xff] %v118_v9 }
  0xdb   :  { %121 = vst [vmem:[#allocation2] sm:$0xff] %v113_v11 }
  0xde   :  { %v178_v12 = vpop.f32.mrb[0].mxu1 }
  0xdf   :  { %v888_v13 = vpop.f32.mrb[1].mxu1 }
  0xe0   :  { %v181_v14 = vpop.f32.mrb[2].mxu1 }
  0xe1   :  { %v889_v15 = vpop.f32.mrb[3].mxu1 }
  0xe2   :  { %v127_v16 = vld [vmem:[#allocation2] sm:$0x3]  ;;  %v209_v33 = vld [vmem:[#allocation2 + $0x2] sm:$0x3]  ;;  %v282_v54 = vld [vmem:[#allocation2 + $0x4] sm:$0x3] }
  0xe3   :  { %v184_v17 = vadd.f32 %v178_v12, %v127_v16  ;;  %v355_v14 = vld [vmem:[#allocation2 + $0x6] sm:$0x3] }
  0xe5   :  { %972 = vtanh.f32 %v184_v17  ;;  %v828_v19 = vmul.f32 -1.442695, %v184_v17 }
  0xe7   :  { %974 = vpow2.f32 %v828_v19 }
  0xef   :  { %v973_v18 = vpop.eup %972 }
  0xf0   :  { %194 = vrot.lane.b32.xlu0 %v973_v18, %s1063_s30 }
  0xf1   :  { %v975_v20 = vpop.eup %974 }
  0xf2   :  { %v188_v21 = vadd.f32 1.0, %v975_v20 }
  0xf4   :  { %976 = vrcp.f32 %v188_v21 }
  0xfe   :  { %v977_v22 = vpop.eup %976 }
  0xff   :  { %v192_v25 = vmul.f32 0.0, %v977_v22 }
 0x162   :  { %v195_v23 = vpop.permute.xlu0 %194 }
 0x163   :  { %v197_v24 = vmul.f32 %v977_v22, %v195_v23 }
 0x165   :  { %199 = vrot.lane.b32.xlu0 %v197_v24, %s1063_s30 }
 0x1d7   :  { %v200_v26 = vpop.permute.xlu0 %199 }
 0x1d8   :  { %v202_v27 = vadd.f32 %v200_v26, %v192_v25 }
 0x1da   :  { %978 = vtanh.f32 %v202_v27 }
 0x1e4   :  { %v979_v28 = vpop.eup %978 }
 0x1e5   :  { %205 = vrot.lane.b32.xlu1 %v979_v28, %s1063_s30 }
 0x257   :  { %v206_v29 = vpop.permute.xlu1 %205 }
 0x258   :  { %v208_v30 = vmul.f32 %v977_v22, %v206_v29 }
 0x25a   :  { %v210_v31 = vpack.c.bf16 %v208_v30, %v208_v30 }
 0x25c   :  { %212 = vrot.lane.b32.xlu1 %v210_v31, %s1064_s3 }
 0x2ce   :  { %v213_v32 = vpop.permute.xlu1 %212 }
 0x2cf   :  { %895 = vmatmul.mubr.msk.bf16.vlgmr.msra.gmra.mrb[4].mxu0 %vm140_vm3, %v213_v32 }
 0x2d0   :  { %907 = vmatpush3.bf16.msra.mxu0 %v1114_v3  ;;  %910 = vmatprep.mubr.msk.bf16.mxu0 %vm1061_vm2, %v1060_v4 }
 0x2d1   :  { %908 = vmatprep.subr.bf16.mxu0 %v1060_v4 }
 0x2d4   :  { %909 = vmatpush3.bf16.msra.mxu0 %v1121_v5 }
 0x2d5   :  { %922 = vmatprep.subr.bf16.mxu0 %v1060_v4 }
 0x3a2   :  { %v251_v34 = vpop.f32.mrb[4].mxu0 }
 0x3a3   :  { %v257_v35 = vadd.f32 %v251_v34, %v209_v33  ;;  %v896_v36 = vpop.f32.mrb[5].mxu0 }
 0x3a4   :  { %v254_v37 = vpop.f32.mrb[6].mxu0 }
 0x3a5   :  { %980 = vtanh.f32 %v257_v35  ;;  %v897_v38 = vpop.f32.mrb[7].mxu0  ;;  %v830_v40 = vmul.f32 -1.442695, %v257_v35  ;;  %v428_v35 = vld [vmem:[#allocation2 + $0x8] sm:$0x3] }
 0x3a7   :  { %982 = vpow2.f32 %v830_v40 }
 0x3af   :  { %v981_v39 = vpop.eup %980 }
 0x3b0   :  { %267 = vrot.lane.b32.xlu0 %v981_v39, %s1063_s30 }
 0x3b1   :  { %v983_v41 = vpop.eup %982 }
 0x3b2   :  { %v261_v42 = vadd.f32 1.0, %v983_v41 }
 0x3b4   :  { %984 = vrcp.f32 %v261_v42 }
 0x3be   :  { %v985_v43 = vpop.eup %984 }
 0x3bf   :  { %v265_v46 = vmul.f32 %v985_v43, %v202_v27 }
 0x422   :  { %v268_v44 = vpop.permute.xlu0 %267 }
 0x423   :  { %v270_v45 = vmul.f32 %v985_v43, %v268_v44 }
 0x425   :  { %272 = vrot.lane.b32.xlu1 %v270_v45, %s1063_s30 }
 0x497   :  { %v273_v47 = vpop.permute.xlu1 %272 }
 0x498   :  { %v275_v48 = vadd.f32 %v273_v47, %v265_v46 }
 0x49a   :  { %986 = vtanh.f32 %v275_v48 }
 0x4a4   :  { %v987_v49 = vpop.eup %986 }
 0x4a5   :  { %278 = vrot.lane.b32.xlu0 %v987_v49, %s1063_s30 }
 0x517   :  { %v279_v50 = vpop.permute.xlu0 %278 }
 0x518   :  { %v281_v51 = vmul.f32 %v985_v43, %v279_v50 }
 0x51a   :  { %v283_v52 = vpack.c.bf16 %v281_v51, %v281_v51 }
 0x51c   :  { %285 = vrot.lane.b32.xlu1 %v283_v52, %s1064_s3 }
 0x58e   :  { %v286_v53 = vpop.permute.xlu1 %285 }
 0x58f   :  { %903 = vmatmul.mubr.msk.bf16.vlgmr.msra.gmra.mrb[4].mxu1 %vm140_vm3, %v286_v53 }
 0x590   :  { %915 = vmatpush3.bf16.msra.mxu1 %v1114_v3  ;;  %918 = vmatprep.mubr.msk.bf16.mxu1 %vm1061_vm2, %v1060_v4 }
 0x591   :  { %916 = vmatprep.subr.bf16.mxu1 %v1060_v4 }
 0x594   :  { %917 = vmatpush3.bf16.msra.mxu1 %v1121_v5 }
 0x595   :  { %930 = vmatprep.subr.bf16.mxu1 %v1060_v4 }
 0x662   :  { %v324_v55 = vpop.f32.mrb[4].mxu1 }
 0x663   :  { %v330_v56 = vadd.f32 %v324_v55, %v282_v54  ;;  %v904_v57 = vpop.f32.mrb[5].mxu1 }
 0x664   :  { %v327_v58 = vpop.f32.mrb[6].mxu1 }
 0x665   :  { %988 = vtanh.f32 %v330_v56  ;;  %v905_v59 = vpop.f32.mrb[7].mxu1  ;;  %v832_v61 = vmul.f32 -1.442695, %v330_v56  ;;  %v501_v56 = vld [vmem:[#allocation2 + $0xa] sm:$0x3] }
 0x667   :  { %990 = vpow2.f32 %v832_v61 }
 0x66f   :  { %v989_v60 = vpop.eup %988 }
 0x670   :  { %340 = vrot.lane.b32.xlu0 %v989_v60, %s1063_s30 }
 0x671   :  { %v991_v62 = vpop.eup %990 }
 0x672   :  { %v334_v63 = vadd.f32 1.0, %v991_v62 }
 0x674   :  { %992 = vrcp.f32 %v334_v63 }
 0x67e   :  { %v993_v0 = vpop.eup %992 }
 0x67f   :  { %v338_v6 = vmul.f32 %v993_v0, %v275_v48 }
 0x6e2   :  { %v341_v1 = vpop.permute.xlu0 %340 }
 0x6e3   :  { %v343_v2 = vmul.f32 %v993_v0, %v341_v1 }
 0x6e5   :  { %345 = vrot.lane.b32.xlu1 %v343_v2, %s1063_s30 }
 0x757   :  { %v346_v7 = vpop.permute.xlu1 %345 }
 0x758   :  { %v348_v8 = vadd.f32 %v346_v7, %v338_v6 }
 0x75a   :  { %994 = vtanh.f32 %v348_v8 }
 0x764   :  { %v995_v9 = vpop.eup %994 }
 0x765   :  { %351 = vrot.lane.b32.xlu0 %v995_v9, %s1063_s30 }
 0x7d7   :  { %v352_v10 = vpop.permute.xlu0 %351 }
 0x7d8   :  { %v354_v11 = vmul.f32 %v993_v0, %v352_v10 }
 0x7da   :  { %v356_v12 = vpack.c.bf16 %v354_v11, %v354_v11 }
 0x7dc   :  { %358 = vrot.lane.b32.xlu1 %v356_v12, %s1064_s3 }
 0x84e   :  { %v359_v13 = vpop.permute.xlu1 %358 }
 0x84f   :  { %911 = vmatmul.mubr.msk.bf16.vlgmr.msra.gmra.mrb[8].mxu0 %vm140_vm3, %v359_v13 }
 0x850   :  { %923 = vmatpush3.bf16.msra.mxu0 %v1114_v3  ;;  %926 = vmatprep.mubr.msk.bf16.mxu0 %vm1061_vm2, %v1060_v4 }
 0x851   :  { %924 = vmatprep.subr.bf16.mxu0 %v1060_v4 }
 0x854   :  { %925 = vmatpush3.bf16.msra.mxu0 %v1121_v5 }
 0x855   :  { %938 = vmatprep.subr.bf16.mxu0 %v1060_v4 }
 0x922   :  { %v397_v15 = vpop.f32.mrb[8].mxu0 }
 0x923   :  { %v403_v16 = vadd.f32 %v397_v15, %v355_v14  ;;  %v912_v17 = vpop.f32.mrb[9].mxu0  ;;  %v574_v14 = vld [vmem:[#allocation2 + $0xc] sm:$0x3] }
 0x924   :  { %v400_v18 = vpop.f32.mrb[10].mxu0 }
 0x925   :  { %996 = vtanh.f32 %v403_v16  ;;  %v913_v19 = vpop.f32.mrb[11].mxu0  ;;  %v834_v21 = vmul.f32 -1.442695, %v403_v16 }
 0x927   :  { %998 = vpow2.f32 %v834_v21 }
 0x92f   :  { %v997_v20 = vpop.eup %996 }
 0x930   :  { %413 = vrot.lane.b32.xlu0 %v997_v20, %s1063_s30 }
 0x931   :  { %v999_v22 = vpop.eup %998 }
 0x932   :  { %v407_v23 = vadd.f32 1.0, %v999_v22 }
 0x934   :  { %1000 = vrcp.f32 %v407_v23 }
 0x93e   :  { %v1001_v24 = vpop.eup %1000 }
 0x93f   :  { %v411_v27 = vmul.f32 %v1001_v24, %v348_v8 }
 0x9a2   :  { %v414_v25 = vpop.permute.xlu0 %413 }
 0x9a3   :  { %v416_v26 = vmul.f32 %v1001_v24, %v414_v25 }
 0x9a5   :  { %418 = vrot.lane.b32.xlu1 %v416_v26, %s1063_s30 }
 0xa17   :  { %v419_v28 = vpop.permute.xlu1 %418 }
 0xa18   :  { %v421_v29 = vadd.f32 %v419_v28, %v411_v27 }
 0xa1a   :  { %1002 = vtanh.f32 %v421_v29 }
 0xa24   :  { %v1003_v30 = vpop.eup %1002 }
 0xa25   :  { %424 = vrot.lane.b32.xlu0 %v1003_v30, %s1063_s30 }
 0xa97   :  { %v425_v31 = vpop.permute.xlu0 %424 }
 0xa98   :  { %v427_v32 = vmul.f32 %v1001_v24, %v425_v31 }
 0xa9a   :  { %v429_v33 = vpack.c.bf16 %v427_v32, %v427_v32 }
 0xa9c   :  { %431 = vrot.lane.b32.xlu1 %v429_v33, %s1064_s3 }
 0xb0e   :  { %v432_v34 = vpop.permute.xlu1 %431 }
 0xb0f   :  { %919 = vmatmul.mubr.msk.bf16.vlgmr.msra.gmra.mrb[8].mxu1 %vm140_vm3, %v432_v34  ;;  %v647_v34 = vld [vmem:[#allocation2 + $0xe] sm:$0x3] }
 0xb10   :  { %931 = vmatpush3.bf16.msra.mxu1 %v1114_v3  ;;  %934 = vmatprep.mubr.msk.bf16.mxu1 %vm1061_vm2, %v1060_v4 }
 0xb11   :  { %932 = vmatprep.subr.bf16.mxu1 %v1060_v4 }
 0xb14   :  { %933 = vmatpush3.bf16.msra.mxu1 %v1121_v5 }
 0xbe2   :  { %v470_v36 = vpop.f32.mrb[8].mxu1 }
 0xbe3   :  { %v476_v37 = vadd.f32 %v470_v36, %v428_v35  ;;  %v920_v38 = vpop.f32.mrb[9].mxu1 }
 0xbe4   :  { %v473_v39 = vpop.f32.mrb[10].mxu1 }
 0xbe5   :  { %1004 = vtanh.f32 %v476_v37  ;;  %v921_v40 = vpop.f32.mrb[11].mxu1  ;;  %v836_v42 = vmul.f32 -1.442695, %v476_v37 }
 0xbe7   :  { %1006 = vpow2.f32 %v836_v42 }
 0xbef   :  { %v1005_v41 = vpop.eup %1004 }
 0xbf0   :  { %486 = vrot.lane.b32.xlu0 %v1005_v41, %s1063_s30 }
 0xbf1   :  { %v1007_v43 = vpop.eup %1006 }
 0xbf2   :  { %v480_v44 = vadd.f32 1.0, %v1007_v43 }
 0xbf4   :  { %1008 = vrcp.f32 %v480_v44 }
 0xbfe   :  { %v1009_v45 = vpop.eup %1008 }
 0xbff   :  { %v484_v48 = vmul.f32 %v1009_v45, %v421_v29 }
 0xc62   :  { %v487_v46 = vpop.permute.xlu0 %486 }
 0xc63   :  { %v489_v47 = vmul.f32 %v1009_v45, %v487_v46 }
 0xc65   :  { %491 = vrot.lane.b32.xlu1 %v489_v47, %s1063_s30 }
 0xcd7   :  { %v492_v49 = vpop.permute.xlu1 %491 }
 0xcd8   :  { %v494_v50 = vadd.f32 %v492_v49, %v484_v48 }
 0xcda   :  { %1010 = vtanh.f32 %v494_v50 }
 0xce4   :  { %v1011_v51 = vpop.eup %1010 }
 0xce5   :  { %497 = vrot.lane.b32.xlu0 %v1011_v51, %s1063_s30  ;;  %v721_v51 = vld [vmem:[%s1245_s4 + $0x8] sm:$0xff] }
 0xd57   :  { %v498_v52 = vpop.permute.xlu0 %497 }
 0xd58   :  { %v500_v53 = vmul.f32 %v1009_v45, %v498_v52  ;;  %v722_v52 = vld [vmem:[%s1245_s4 + $0x10] sm:$0xff] }
 0xd5a   :  { %v502_v54 = vpack.c.bf16 %v500_v53, %v500_v53  ;;  %v1065_v53 = vmov 0.0|0.0  }
 0xd5b   :  { %957 = vmatprep.subr.bf16.mxu1 %v1065_v53 }
 0xd5c   :  { %504 = vrot.lane.b32.xlu1 %v502_v54, %s1064_s3 }
 0xdce   :  { %v505_v55 = vpop.permute.xlu1 %504 }
 0xdcf   :  { %927 = vmatmul.mubr.msk.bf16.vlgmr.msra.gmra.mrb[12].mxu0 %vm140_vm3, %v505_v55  ;;  %v723_v55 = vld [vmem:[%s1245_s4 + $0x18] sm:$0xff] }
 0xdd0   :  { %939 = vmatpush3.bf16.msra.mxu0 %v1114_v3  ;;  %942 = vmatprep.mubr.msk.bf16.mxu0 %vm1061_vm2, %v1060_v4 }
 0xdd1   :  { %940 = vmatprep.subr.bf16.mxu0 %v1060_v4 }
 0xdd4   :  { %941 = vmatpush3.bf16.msra.mxu0 %v1121_v5 }
 0xea2   :  { %v543_v57 = vpop.f32.mrb[12].mxu0 }
 0xea3   :  { %v549_v58 = vadd.f32 %v543_v57, %v501_v56  ;;  %v928_v59 = vpop.f32.mrb[13].mxu0  ;;  %v961_v56 = vpack.c.bf16 %v723_v55, %v722_v52 }
 0xea4   :  { %v546_v60 = vpop.f32.mrb[14].mxu0 }
 0xea5   :  { %1012 = vtanh.f32 %v549_v58  ;;  %v929_v61 = vpop.f32.mrb[15].mxu0  ;;  %v838_v63 = vmul.f32 -1.442695, %v549_v58 }
 0xea6   :  { %v843_v61 = vld [vmem:[%s1246_s5] ss:$0 sm:$0xff] }
 0xea7   :  { %1014 = vpow2.f32 %v838_v63 }
 0xeaf   :  { %v1013_v62 = vpop.eup %1012 }
 0xeb0   :  { %559 = vrot.lane.b32.xlu0 %v1013_v62, %s1063_s30 }
 0xeb1   :  { %v1015_v3 = vpop.eup %1014 }
 0xeb2   :  { %v553_v0 = vadd.f32 1.0, %v1015_v3 }
 0xeb4   :  { %1016 = vrcp.f32 %v553_v0 }
 0xebe   :  { %v1017_v1 = vpop.eup %1016 }
 0xebf   :  { %v557_v5 = vmul.f32 %v1017_v1, %v494_v50  ;;  %v720_v50 = vld [vmem:[%s1245_s4] sm:$0xff]  ;;  %s814_s4 = sshll.u32 %s1066_s17, 4  ;;  %s815_s4 = int_to_ptr.vmem [resolvable:$true] %s814_s4 }
 0xec0   :  { %v958_v54 = vpack.c.bf16 %v721_v51, %v720_v50  ;;  %s1036_s18 = scalar_lea.vmem %s815_s4, 32  ;;  %p1041_p1 = scmp.lt.s32.totalorder %s815_s4, %s815_s4 }
 0xec1   :  { %p1037_p0 = scmp.ne.s32.totalorder %s815_s4, %s1036_s18  ;;  %p1042_p2 = scmp.lt.s32.totalorder %s1036_s18, %s1036_s18 }
 0xec3   :  { %p1043_p3 = por %p1042_p2, %p1041_p1 }
 0xec5   :  { %p1044_p4 = pnand %p1043_p3, %p1037_p0 }
 0xf22   :  { %v560_v2 = vpop.permute.xlu0 %559 }
 0xf23   :  { %v562_v6 = vmul.f32 %v1017_v1, %v560_v2 }
 0xf25   :  { %564 = vrot.lane.b32.xlu1 %v562_v6, %s1063_s30 }
 0xf97   :  { %v565_v7 = vpop.permute.xlu1 %564 }
 0xf98   :  { %v567_v8 = vadd.f32 %v565_v7, %v557_v5 }
 0xf9a   :  { %1018 = vtanh.f32 %v567_v8 }
 0xfa4   :  { %v1019_v9 = vpop.eup %1018 }
 0xfa5   :  { %570 = vrot.lane.b32.xlu0 %v1019_v9, %s1063_s30 }
0x1017   :  { %v571_v10 = vpop.permute.xlu0 %570 }
0x1018   :  { %v573_v11 = vmul.f32 %v1017_v1, %v571_v10 }
0x101a   :  { %v575_v12 = vpack.c.bf16 %v573_v11, %v573_v11 }
0x101c   :  { %577 = vrot.lane.b32.xlu1 %v575_v12, %s1064_s3 }
0x108e   :  { %v578_v13 = vpop.permute.xlu1 %577 }
0x108f   :  { %935 = vmatmul.mubr.msk.bf16.vlgmr.msra.gmra.mrb[12].mxu1 %vm140_vm3, %v578_v13 }
0x1090   :  { %954 = vmatprep.mubr.msk.f32.mxu1 %vm1061_vm2, %v1060_v4  ;;  %959 = vmatpush3.bf16.msra.mxu1 %v958_v54 }
0x1091   :  { %960 = vmatprep.subr.bf16.mxu1 %v1065_v53 }
0x1094   :  { %962 = vmatpush3.bf16.msra.mxu1 %v961_v56 }
0x1162   :  { %v616_v15 = vpop.f32.mrb[12].mxu1 }
0x1163   :  { %v622_v16 = vadd.f32 %v616_v15, %v574_v14  ;;  %v936_v17 = vpop.f32.mrb[13].mxu1 }
0x1164   :  { %v619_v18 = vpop.f32.mrb[14].mxu1 }
0x1165   :  { %1020 = vtanh.f32 %v622_v16  ;;  %v937_v19 = vpop.f32.mrb[15].mxu1  ;;  %v840_v21 = vmul.f32 -1.442695, %v622_v16 }
0x1167   :  { %1022 = vpow2.f32 %v840_v21 }
0x116f   :  { %v1021_v20 = vpop.eup %1020 }
0x1170   :  { %632 = vrot.lane.b32.xlu0 %v1021_v20, %s1063_s30 }
0x1171   :  { %v1023_v22 = vpop.eup %1022 }
0x1172   :  { %v626_v23 = vadd.f32 1.0, %v1023_v22 }
0x1174   :  { %1024 = vrcp.f32 %v626_v23 }
0x117e   :  { %v1025_v24 = vpop.eup %1024 }
0x117f   :  { %v630_v4 = vmul.f32 %v1025_v24, %v567_v8 }
0x11e2   :  { %v633_v25 = vpop.permute.xlu0 %632 }
0x11e3   :  { %v635_v26 = vmul.f32 %v1025_v24, %v633_v25 }
0x11e5   :  { %637 = vrot.lane.b32.xlu1 %v635_v26, %s1063_s30 }
0x1257   :  { %v638_v27 = vpop.permute.xlu1 %637 }
0x1258   :  { %v640_v28 = vadd.f32 %v638_v27, %v630_v4 }
0x125a   :  { %1026 = vtanh.f32 %v640_v28 }
0x1264   :  { %v1027_v29 = vpop.eup %1026 }
0x1265   :  { %643 = vrot.lane.b32.xlu0 %v1027_v29, %s1063_s30 }
0x12d7   :  { %v644_v30 = vpop.permute.xlu0 %643 }
0x12d8   :  { %v646_v31 = vmul.f32 %v1025_v24, %v644_v30 }
0x12da   :  { %v648_v32 = vpack.c.bf16 %v646_v31, %v646_v31 }
0x12dc   :  { %650 = vrot.lane.b32.xlu1 %v648_v32, %s1064_s3 }
0x134e   :  { %v651_v33 = vpop.permute.xlu1 %650 }
0x134f   :  { %943 = vmatmul.mubr.msk.bf16.vlgmr.msra.gmra.mrb[16].mxu0 %vm140_vm3, %v651_v33 }
0x1422   :  { %v689_v35 = vpop.f32.mrb[16].mxu0 }
0x1423   :  { %v695_v36 = vadd.f32 %v689_v35, %v647_v34  ;;  %v944_v37 = vpop.f32.mrb[17].mxu0 }
0x1424   :  { %v692_v38 = vpop.f32.mrb[18].mxu0 }
0x1425   :  { %1028 = vtanh.f32 %v695_v36  ;;  %v945_v39 = vpop.f32.mrb[19].mxu0  ;;  %v842_v41 = vmul.f32 -1.442695, %v695_v36 }
0x1427   :  { %1030 = vpow2.f32 %v842_v41 }
0x142f   :  { %v1029_v40 = vpop.eup %1028 }
0x1430   :  { %705 = vrot.lane.b32.xlu0 %v1029_v40, %s1063_s30 }
0x1431   :  { %v1031_v42 = vpop.eup %1030 }
0x1432   :  { %v699_v43 = vadd.f32 1.0, %v1031_v42 }
0x1434   :  { %1032 = vrcp.f32 %v699_v43 }
0x143e   :  { %v1033_v44 = vpop.eup %1032 }
0x143f   :  { %v703_v47 = vmul.f32 %v1033_v44, %v640_v28 }
0x14a2   :  { %v706_v45 = vpop.permute.xlu0 %705 }
0x14a3   :  { %v708_v46 = vmul.f32 %v1033_v44, %v706_v45 }
0x14a5   :  { %710 = vrot.lane.b32.xlu1 %v708_v46, %s1063_s30 }
0x1517   :  { %v711_v48 = vpop.permute.xlu1 %710 }
0x1518   :  { %v713_v49 = vadd.f32 %v711_v48, %v703_v47 }
0x151a   :  { %1034 = vtanh.f32 %v713_v49 }
0x1524   :  { %v1035_v57 = vpop.eup %1034 }
0x1525   :  { %716 = vrot.lane.b32.xlu0 %v1035_v57, %s1063_s30 }
0x1597   :  { %v717_v58 = vpop.permute.xlu0 %716 }
0x1598   :  { %v719_v59 = vmul.f32 %v1033_v44, %v717_v58 }
0x159a   :  { %732 = vrot.lane.b32.xlu1 %v719_v59, %s1064_s3 }
0x160c   :  { %v733_v60 = vpop.permute.xlu1 %732 }
0x160d   :  { %955 = vmatmul.mubr.msk.f32.vlgmr.msra.gmra.mrb[16].mxu1 %vm140_vm3, %v733_v60 }
0x16e0   :  { %v802_v62 = vpop.f32.mrb[16].mxu1 }
0x16e1   :  { %v803_v63 = vadd.f32 %v843_v61, %v802_v62  ;;  %v956_v3 = vpop.f32.mrb[17].mxu1 }
0x16e3   :  { %807 = vst.msk [vmem:[#allocation3] sm:$0x3] %vm806_vm4, %v803_v63 }
0x16e4   :  { %1047 = shalt.err (!%p1044_p4)
}
0x16e5   :  { %s1048_s21 = scalar_lea.hbm %s1247_s6, 32 }
0x16e6   :  { %p1049_p5 = scmp.ne.s32.totalorder %s1247_s6, %s1048_s21  ;;  %p1052_p6 = scmp.lt.u32.totalorder %s1048_s21, %s1247_s6 }
0x16e8   :  { %p1054_p7 = pnand %p1052_p6, %p1049_p5 }
0x16ea   :  { %1057 = shalt.err (!%p1054_p7)
}
0x16eb   :  { %817 = dma.vmem_to_hbm [thread:$0]  %s815_s4, 32, %s1247_s6, [#allocation4]  }
0x16ec   :  { %1058 = dma.done.wait [#allocation4], 32  }
0x16ed   :  { %1059 = vsyncadd [#allocation4], 4294967264 }
0x16ee   :  { %821 = vsyncpa [#allocation4], 1 }

</bundles_post_ra>
